<compile_context>
chip_gen: v7x
topology: tpu7x:2x2x1
jax: 0.10.0
libtpu: 0.0.40
codegen_flags: <defaults>
</compile_context>

<pallas_src>
import jax
import jax.numpy as jnp
from jax.experimental import pallas as pl
from jax.experimental.pallas import tpu as pltpu

LN_EPS = 1e-5  # torch.nn.LayerNorm default


# ----------------------------------------------------------------------------
# VMEM budgeting / tile selection
# ----------------------------------------------------------------------------
def _vmem_budget():
    """Returns (vmem_limit_bytes, tile_footprint_budget), per TPU generation."""
    cap = 128 * 1024 * 1024                      # v5e / v6e physical VMEM
    try:
        info = pltpu.get_tpu_info()
        cap = int(getattr(info, "vmem_capacity_bytes", cap))
    except Exception:
        pass
    # Use 3/4 of physical as the scoped limit (96 MiB on v5e/v6e, 48 MiB on
    # v7x's 64 MiB), and half of that as the pipeline-footprint target so the
    # 2-deep double-buffering always fits.
    limit = min((cap * 3) // 4, 96 * 1024 * 1024)
    return int(limit), int(limit // 2)


def _pick_row_tile(rows, lanes, itemsize, budget):
    """Largest row tile whose pipeline footprint fits `budget` bytes of VMEM."""
    # Per-row footprint: 2 pipeline buffers x (input + output tile) in the real
    # dtype, plus ~4 tile-sized f32 temporaries live in the kernel
    # (x_f32, mean, E[x^2]/inv, pre-cast result).
    per_row = 2 * lanes * 2 * itemsize + 4 * lanes * 4
    cap = max(8, int(budget) // per_row)
    if rows <= cap:
        # Single block covering the whole array: block_shape == array shape is
        # always legal regardless of (8, 128) divisibility, and grid == 1.
        return int(rows)
    # dtype-correct sublane multiple: 8 (f32), 16 (bf16/f16), 32 (int8/fp8).
    sub = max(8, 32 // itemsize)
    return int(max((cap // sub) * sub, sub))


# ----------------------------------------------------------------------------
# Kernels
# ----------------------------------------------------------------------------
def _make_ln_kernel_packed(seg_len, eps):
    """LayerNorm on a lane-packed (row_tile, g*seg_len) tile (g*seg_len == 128).

    Each 128-lane row holds g = 128 // seg_len independent feature rows; the
    per-segment reductions are done on the MXU with a one-hot segment matrix.
    """
    inv_d = 1.0 / float(seg_len)
    hp = jax.lax.Precision.HIGHEST  # keep f32 statistics exact on the MXU

    def kernel(x_ref, gamma_ref, beta_ref, seg_ref, seg_t_ref, o_ref):
        x = x_ref[...].astype(jnp.float32)            # (tm, L), lane-dense
        seg = seg_ref[...]                            # (L, 128) one-hot: lane -> segment
        seg_t = seg_t_ref[...]                        # (128, L) segment -> lane
        # One data pass: per-segment sum(x) and sum(x*x) on the otherwise-idle MXU.
        s1 = jnp.dot(x, seg, preferred_element_type=jnp.float32, precision=hp)
        s2 = jnp.dot(x * x, seg, preferred_element_type=jnp.float32, precision=hp)
        # Broadcast the per-segment stats back to every lane of the segment.
        mean = jnp.dot(s1, seg_t, preferred_element_type=jnp.float32, precision=hp) * inv_d
        ex2 = jnp.dot(s2, seg_t, preferred_element_type=jnp.float32, precision=hp) * inv_d
        # var = E[x^2] - mean^2 (single pass); clamp guards tiny negative
        # values from f32 cancellation.  Matches PyTorch's biased variance.
        var = jnp.maximum(ex2 - mean * mean, 0.0)
        inv = jax.lax.rsqrt(var + eps)
        o_ref[...] = ((x - mean) * inv * gamma_ref[...] + beta_ref[...]).astype(o_ref.dtype)

    return kernel


def _make_ln_kernel_plain(eps):
    """LayerNorm over the last axis of an unpacked (row_tile, D) tile."""

    def kernel(x_ref, gamma_ref, beta_ref, o_ref):
        x = x_ref[...].astype(jnp.float32)            # (tm, D)
        mean = jnp.mean(x, axis=-1, keepdims=True)
        ex2 = jnp.mean(x * x, axis=-1, keepdims=True)
        var = jnp.maximum(ex2 - mean * mean, 0.0)     # one pass; biased var
        inv = jax.lax.rsqrt(var + eps)
        o_ref[...] = ((x - mean) * inv * gamma_ref[...] + beta_ref[...]).astype(o_ref.dtype)

    return kernel


# ----------------------------------------------------------------------------
# Wrapper
# ----------------------------------------------------------------------------
def layernorm_pallas(x, gamma, beta, *, eps=LN_EPS, row_tile=None, lane_pack=True):
    """x: (..., D). gamma/beta: (D,). Returns LayerNorm(x) over the last axis."""
    orig_shape = x.shape
    D = int(orig_shape[-1])
    x2 = x.reshape(-1, D)
    R = int(x2.shape[0])
    itemsize = jnp.dtype(x.dtype).itemsize

    gamma = jnp.asarray(gamma, jnp.float32).reshape(-1)
    beta = jnp.asarray(beta, jnp.float32).reshape(-1)

    # Lane packing: (R, D) -> (R/g, g*D) with g = 128 // D (free, contiguous
    # reshape) so loads / VPU math / stores are lane-dense for SAINT's D < 128.
    g = 1
    if lane_pack and D < 128 and 128 % D == 0:
        gg = 128 // D
        if R % gg == 0:
            g = gg
    L = g * D
    Rp = R // g
    xp = x2.reshape(Rp, L)

    gamma_p = jnp.tile(gamma, (g,)).reshape(1, L)
    beta_p = jnp.tile(beta, (g,)).reshape(1, L)

    vmem_limit, tile_budget = _vmem_budget()
    if row_tile is None:
        row_tile = _pick_row_tile(Rp, L, itemsize, tile_budget)
    row_tile = int(min(int(row_tile), Rp))
    num_blocks = pl.cdiv(Rp, row_tile)

    in_specs = [
        pl.BlockSpec((row_tile, L), lambda i: (i, 0)),
        pl.BlockSpec((1, L), lambda i: (0, 0)),       # gamma, resident
        pl.BlockSpec((1, L), lambda i: (0, 0)),       # beta, resident
    ]
    args = [xp, gamma_p, beta_p]

    if g > 1:
        # One-hot segment matrix (lane -> segment id) and its transpose, padded
        # to 128 columns so all MXU operands are 128-aligned.
        lane_seg = jnp.arange(L, dtype=jnp.int32) // D                      # (L,)
        seg = (lane_seg[:, None] == jnp.arange(128, dtype=jnp.int32)[None, :]).astype(jnp.float32)
        seg_t = seg.T
        in_specs += [
            pl.BlockSpec((L, 128), lambda i: (0, 0)),                       # seg, resident
            pl.BlockSpec((128, L), lambda i: (0, 0)),                       # seg.T, resident
        ]
        args += [seg, seg_t]
        kernel = _make_ln_kernel_packed(D, eps)
    else:
        kernel = _make_ln_kernel_plain(eps)

    flops = 10 * R * D + (8 * 128 * R * D if g > 1 else 4 * R * D)
    cost = pl.CostEstimate(
        flops=int(flops),
        transcendentals=int(R),                       # one rsqrt per row
        bytes_accessed=int(2 * R * D * itemsize + 2 * L * 4 + (g > 1) * 2 * L * 128 * 4),
    )

    out = pl.pallas_call(
        kernel,
        out_shape=jax.ShapeDtypeStruct((Rp, L), x.dtype),
        grid_spec=pltpu.PrefetchScalarGridSpec(
            num_scalar_prefetch=0,
            grid=(num_blocks,),
            in_specs=in_specs,
            out_specs=pl.BlockSpec((row_tile, L), lambda i: (i, 0)),
        ),
        compiler_params=pltpu.CompilerParams(
            dimension_semantics=("parallel",),
            vmem_limit_bytes=vmem_limit,
        ),
        cost_estimate=cost,
    )(*args)

    return out.reshape(orig_shape)


class PreNorm:
    """JAX/Pallas equivalent of the PyTorch PreNorm module."""

    def __init__(self, dim, fn):
        self.dim = dim
        self.fn = fn
        # torch.nn.LayerNorm default init (weight = 1, bias = 0), created once
        # in f32 so no per-call casts are emitted around the pallas_call.
        self.gamma = jnp.ones((dim,), jnp.float32)
        self.beta = jnp.zeros((dim,), jnp.float32)

    def __call__(self, x, **kwargs):
        return self.fn(layernorm_pallas(x, self.gamma, self.beta), **kwargs)


# ----------------------------------------------------------------------------
# Reference + tests
# ----------------------------------------------------------------------------
def _layernorm_ref(x, gamma, beta):
    x = x.astype(jnp.float32)
    mean = jnp.mean(x, axis=-1, keepdims=True)
    var = jnp.mean((x - mean) ** 2, axis=-1, keepdims=True)
    return (x - mean) * jax.lax.rsqrt(var + LN_EPS) * gamma + beta


if __name__ == "__main__":
    key = jax.random.PRNGKey(0)
    k1, k2, k3, k4, k5, k6, k7, kw, kb = jax.random.split(key, 9)

    # --- test 1: SAINT-like PreNorm end to end (D=32 -> packed, g=4, 1 block) ----
    B, S, D = 2, 8, 32
    x = jax.random.normal(k1, (B, S, D), dtype=jnp.float32)
    w = (jax.random.normal(kw, (D, D), dtype=jnp.float32) / jnp.sqrt(D)).astype(jnp.float32)
    b = jax.random.normal(kb, (D,), dtype=jnp.float32) * 0.01

    def fn(h):
        # Deterministic Linear(dim, dim) stand-in for the wrapped Attention / FF.
        return jnp.einsum("bsd,de->bse", h, w) + b

    module = PreNorm(D, fn)
    out = jax.block_until_ready(module(x))
    ref = fn(_layernorm_ref(x, module.gamma, module.beta))
    assert out.shape == (B, S, D)
    # Segment statistics ride the MXU (multi-pass f32): keep a modest tolerance.
    assert jnp.allclose(out, ref, atol=5e-3, rtol=5e-3), "mismatch (packed, PreNorm)"

    # --- test 2: packed path, multi-block grid with ragged last tile (D=64) ------
    B2, S2, D2 = 2, 10, 64                   # Rp = 10, row_tile=8 -> 2 blocks
    x2 = jax.random.normal(k2, (B2, S2, D2), dtype=jnp.float32)
    g2 = 1.0 + 0.1 * jax.random.normal(k3, (D2,), dtype=jnp.float32)
    b2 = 0.1 * jax.random.normal(k4, (D2,), dtype=jnp.float32)
    out2 = jax.block_until_ready(layernorm_pallas(x2, g2, b2, row_tile=8))
    ref2 = _layernorm_ref(x2, g2, b2)
    assert out2.shape == (B2, S2, D2)
    assert jnp.allclose(out2, ref2, atol=5e-3, rtol=5e-3), "mismatch (packed, ragged)"

    # --- test 3: unpacked fallback path (D=96 is not a divisor of 128) -----------
    B3, S3, D3 = 2, 8, 96
    x3 = jax.random.normal(k5, (B3, S3, D3), dtype=jnp.float32)
    g3 = 1.0 + 0.1 * jax.random.normal(k6, (D3,), dtype=jnp.float32)
    b3 = 0.1 * jax.random.normal(k7, (D3,), dtype=jnp.float32)
    out3 = jax.block_until_ready(layernorm_pallas(x3, g3, b3))
    ref3 = _layernorm_ref(x3, g3, b3)
    assert out3.shape == (B3, S3, D3)
    assert jnp.allclose(out3, ref3, atol=1e-4, rtol=1e-4), "mismatch (plain path)"

    # --- test 4: bf16 input, packed multi-block (sublane multiple of 16) ---------
    B4, S4, D4 = 2, 24, 64                   # Rp = 24, row_tile=16 -> 2 blocks
    x4 = jax.random.normal(k1, (B4, S4, D4), dtype=jnp.float32).astype(jnp.bfloat16)
    g4 = jnp.ones((D4,), jnp.float32)
    b4 = jnp.zeros((D4,), jnp.float32)
    out4 = jax.block_until_ready(layernorm_pallas(x4, g4, b4, row_tile=16))
    ref4 = _layernorm_ref(x4.astype(jnp.float32), g4, b4)
    assert out4.dtype == jnp.bfloat16 and out4.shape == (B4, S4, D4)
    assert jnp.allclose(out4.astype(jnp.float32), ref4, atol=5e-2, rtol=5e-2), "mismatch (bf16)"

    print("KERNEL_OK")
</pallas_src>

<mosaic_0001>
module attributes {stable_mosaic.version = 11 : i64} {
  func.func @kernel(%arg0: i32, %arg1: memref<4x128xf32, #tpu.memory_space<vmem>>, %arg2: memref<1x128xf32, #tpu.memory_space<vmem>>, %arg3: memref<1x128xf32, #tpu.memory_space<vmem>>, %arg4: memref<128x128xf32, #tpu.memory_space<vmem>>, %arg5: memref<128x128xf32, #tpu.memory_space<vmem>>, %arg6: memref<4x128xf32, #tpu.memory_space<vmem>>) attributes {dimension_semantics = [#tpu.dimension_semantics<parallel>], iteration_bounds = array<i64: 1>, scalar_prefetch = 0 : i64, scratch_operands = 0 : i64, tpu.core_type = #tpu.core_type<tc>, window_params = [{transform_indices = @transform_0, window_bounds = array<i64: 4, 128>}, {pipeline_mode = #tpu.pipeline_mode<synchronous>, transform_indices = @transform_1, window_bounds = array<i64: 1, 128>}, {pipeline_mode = #tpu.pipeline_mode<synchronous>, transform_indices = @transform_2, window_bounds = array<i64: 1, 128>}, {pipeline_mode = #tpu.pipeline_mode<synchronous>, transform_indices = @transform_3, window_bounds = array<i64: 128, 128>}, {pipeline_mode = #tpu.pipeline_mode<synchronous>, transform_indices = @transform_4, window_bounds = array<i64: 128, 128>}, {transform_indices = @transform_5, window_bounds = array<i64: 4, 128>}]} {
    %c0 = arith.constant 0 : index
    %c0_0 = arith.constant 0 : index
    %0 = vector.load %arg1[%c0, %c0_0] : memref<4x128xf32, #tpu.memory_space<vmem>>, vector<4x128xf32>
    %c0_1 = arith.constant 0 : index
    %c0_2 = arith.constant 0 : index
    %1 = vector.load %arg4[%c0_1, %c0_2] : memref<128x128xf32, #tpu.memory_space<vmem>>, vector<128x128xf32>
    %c0_3 = arith.constant 0 : index
    %c0_4 = arith.constant 0 : index
    %2 = vector.load %arg5[%c0_3, %c0_4] : memref<128x128xf32, #tpu.memory_space<vmem>>, vector<128x128xf32>
    %cst = arith.constant dense<0.000000e+00> : vector<4x128xf32>
    %3 = tpu.matmul %0, %1, %cst {dimension_numbers = #tpu.dot_dimension_numbers<[1], [0], [0], [1], [0, 0, 1, 1], [], []>, precision = #tpu.contract_precision<fp32>} : vector<4x128xf32>, vector<128x128xf32>, vector<4x128xf32> -> vector<4x128xf32>
    %4 = arith.mulf %0, %0 : vector<4x128xf32>
    %cst_5 = arith.constant dense<0.000000e+00> : vector<4x128xf32>
    %5 = tpu.matmul %4, %1, %cst_5 {dimension_numbers = #tpu.dot_dimension_numbers<[1], [0], [0], [1], [0, 0, 1, 1], [], []>, precision = #tpu.contract_precision<fp32>} : vector<4x128xf32>, vector<128x128xf32>, vector<4x128xf32> -> vector<4x128xf32>
    %cst_6 = arith.constant dense<0.000000e+00> : vector<4x128xf32>
    %6 = tpu.matmul %3, %2, %cst_6 {dimension_numbers = #tpu.dot_dimension_numbers<[1], [0], [0], [1], [0, 0, 1, 1], [], []>, precision = #tpu.contract_precision<fp32>} : vector<4x128xf32>, vector<128x128xf32>, vector<4x128xf32> -> vector<4x128xf32>
    %cst_7 = arith.constant 3.125000e-02 : f32
    %7 = vector.broadcast %cst_7 : f32 to vector<4x128xf32>
    %8 = arith.mulf %6, %7 : vector<4x128xf32>
    %cst_8 = arith.constant dense<0.000000e+00> : vector<4x128xf32>
    %9 = tpu.matmul %5, %2, %cst_8 {dimension_numbers = #tpu.dot_dimension_numbers<[1], [0], [0], [1], [0, 0, 1, 1], [], []>, precision = #tpu.contract_precision<fp32>} : vector<4x128xf32>, vector<128x128xf32>, vector<4x128xf32> -> vector<4x128xf32>
    %cst_9 = arith.constant 3.125000e-02 : f32
    %10 = vector.broadcast %cst_9 : f32 to vector<4x128xf32>
    %11 = arith.mulf %9, %10 : vector<4x128xf32>
    %12 = arith.mulf %8, %8 : vector<4x128xf32>
    %13 = arith.subf %11, %12 : vector<4x128xf32>
    %cst_10 = arith.constant 0.000000e+00 : f32
    %14 = vector.broadcast %cst_10 : f32 to vector<4x128xf32>
    %15 = arith.maximumf %13, %14 : vector<4x128xf32>
    %cst_11 = arith.constant 9.99999974E-6 : f32
    %16 = vector.broadcast %cst_11 : f32 to vector<4x128xf32>
    %17 = arith.addf %15, %16 : vector<4x128xf32>
    %18 = math.rsqrt %17 : vector<4x128xf32>
    %19 = arith.subf %0, %8 : vector<4x128xf32>
    %20 = arith.mulf %19, %18 : vector<4x128xf32>
    %c0_12 = arith.constant 0 : index
    %c0_13 = arith.constant 0 : index
    %21 = vector.load %arg2[%c0_12, %c0_13] : memref<1x128xf32, #tpu.memory_space<vmem>>, vector<1x128xf32>
    %22 = vector.broadcast %21 : vector<1x128xf32> to vector<4x128xf32>
    %23 = arith.mulf %20, %22 : vector<4x128xf32>
    %c0_14 = arith.constant 0 : index
    %c0_15 = arith.constant 0 : index
    %24 = vector.load %arg3[%c0_14, %c0_15] : memref<1x128xf32, #tpu.memory_space<vmem>>, vector<1x128xf32>
    %25 = vector.broadcast %24 : vector<1x128xf32> to vector<4x128xf32>
    %26 = arith.addf %23, %25 : vector<4x128xf32>
    %c0_16 = arith.constant 0 : index
    %c0_17 = arith.constant 0 : index
    %27 = vector.load %arg6[%c0_16, %c0_17] : memref<4x128xf32, #tpu.memory_space<vmem>>, vector<4x128xf32>
    tpu.vector_store %arg6[%c0_16, %c0_17], %26 {strides = array<i32>} : memref<4x128xf32, #tpu.memory_space<vmem>>, vector<4x128xf32>,
    return
  }
  func.func @transform_0(%arg0: i32) -> (i32, i32) {
    %c0_i32 = arith.constant 0 : i32
    %c0_i32_0 = arith.constant 0 : i32
    return %arg0, %c0_i32 : i32, i32
  }
  func.func @transform_1(%arg0: i32) -> (i32, i32) {
    %c0_i32 = arith.constant 0 : i32
    %c0_i32_0 = arith.constant 0 : i32
    %c0_i32_1 = arith.constant 0 : i32
    return %c0_i32, %c0_i32_0 : i32, i32
  }
  func.func @transform_2(%arg0: i32) -> (i32, i32) {
    %c0_i32 = arith.constant 0 : i32
    %c0_i32_0 = arith.constant 0 : i32
    %c0_i32_1 = arith.constant 0 : i32
    return %c0_i32, %c0_i32_0 : i32, i32
  }
  func.func @transform_3(%arg0: i32) -> (i32, i32) {
    %c0_i32 = arith.constant 0 : i32
    %c0_i32_0 = arith.constant 0 : i32
    %c0_i32_1 = arith.constant 0 : i32
    return %c0_i32, %c0_i32_0 : i32, i32
  }
  func.func @transform_4(%arg0: i32) -> (i32, i32) {
    %c0_i32 = arith.constant 0 : i32
    %c0_i32_0 = arith.constant 0 : i32
    %c0_i32_1 = arith.constant 0 : i32
    return %c0_i32, %c0_i32_0 : i32, i32
  }
  func.func @transform_5(%arg0: i32) -> (i32, i32) {
    %c0_i32 = arith.constant 0 : i32
    %c0_i32_0 = arith.constant 0 : i32
    return %arg0, %c0_i32 : i32, i32
  }
}

</mosaic_0001>

<bundles_post_ra>
// kernel: tpu_custom_call.1
= control target key start
LH: loop header
LB: loop body
LE: loop exit
PB: predicated region body
PF: predicated region fallthrough
CT: control target
= control target key end

     0   :  { %10 = vsyncpa [#allocation3], 0  ;;  %s5693_s0 = inlined_call_operand.hbm [shape: f32[4,128], index: 0, kind: input, shape index: {}]   ;;  %s5694_s1 = inlined_call_operand.hbm [shape: f32[1,128], index: 1, kind: input, shape index: {}]   ;;  %s5695_s2 = inlined_call_operand.hbm [shape: f32[1,128], index: 2, kind: input, shape index: {}]   ;;  %s5696_s3 = inlined_call_operand.hbm [shape: f32[128,128], index: 3, kind: input, shape index: {}]   ;;  %s5697_s4 = inlined_call_operand.hbm [shape: f32[128,128], index: 4, kind: input, shape index: {}]   ;;  %s5698_s5 = inlined_call_operand.hbm [shape: f32[4,128], index: 5, kind: output, shape index: {}]  }
   0x1   :  { %11 = vsyncpa [#allocation6], 0 }
   0x2   :  { %12 = vsyncpa [#allocation9], 0 }
   0x3   :  { %13 = vsyncpa [#allocation4], 0  ;;  %s4744_s18 = smov [#allocation5]   ;;  %s4745_s20 = smov [#allocation8]  }
   0x4   :  { %s30_s19 = sshll.u32 %s4744_s18, 4  ;;  %s49_s21 = sshll.u32 %s4745_s20, 4  ;;  %s31_s19 = int_to_ptr.vmem [resolvable:$true] %s30_s19  ;;  %s4785_s21 = int_to_ptr.vmem [resolvable:$true] %s49_s21 }
   0x5   :  { %s4604_s24 = scalar_lea.hbm %s5694_s1, 16 }
   0x6   :  { %p4605_p0 = scmp.ne.s32.totalorder %s5694_s1, %s4604_s24  ;;  %p4608_p1 = scmp.lt.u32.totalorder %s4604_s24, %s5694_s1 }
   0x8   :  { %p4610_p2 = pnand %p4608_p1, %p4605_p0 }
   0xa   :  { %4613 = shalt.err (!%p4610_p2)
}
   0xb   :  { %s4614_s29 = scalar_lea.vmem %s31_s19, 16  ;;  %s4618_s30 = scalar_lea.vmem %s31_s19, 32 }
   0xc   :  { %p4615_p3 = scmp.ne.s32.totalorder %s31_s19, %s4614_s29  ;;  %p4619_p4 = scmp.lt.s32.totalorder %s31_s19, %s31_s19 }
   0xd   :  { %p4620_p5 = scmp.lt.s32.totalorder %s4618_s30, %s4614_s29 }
   0xf   :  { %p4621_p6 = por %p4620_p5, %p4619_p4 }
  0x11   :  { %p4622_p7 = pnand %p4621_p6, %p4615_p3 }
  0x13   :  { %4625 = shalt.err (!%p4622_p7)
}
  0x14   :  { %33 = dma.hbm_to_vmem [thread:$0]  %s5694_s1, 16, %s31_s19, [#allocation6]  }
  0x15   :  { %s4626_s10 = scalar_lea.hbm %s5696_s3, 2048 }
  0x16   :  { %p4627_p8 = scmp.ne.s32.totalorder %s5696_s3, %s4626_s10  ;;  %p4630_p9 = scmp.lt.u32.totalorder %s4626_s10, %s5696_s3 }
  0x18   :  { %p4632_p10 = pnand %p4630_p9, %p4627_p8 }
  0x1a   :  { %4635 = shalt.err (!%p4632_p10)
}
  0x1b   :  { %s4636_s15 = scalar_lea.vmem %s4785_s21, 2048  ;;  %p4641_p12 = scmp.lt.s32.totalorder %s4785_s21, %s4785_s21 }
  0x1c   :  { %p4637_p11 = scmp.ne.s32.totalorder %s4785_s21, %s4636_s15  ;;  %p4642_p13 = scmp.lt.s32.totalorder %s4636_s15, %s4636_s15 }
  0x1e   :  { %p4643_p0 = por %p4642_p13, %p4641_p12 }
  0x20   :  { %p4644_p1 = pnand %p4643_p0, %p4637_p11 }
  0x22   :  { %4647 = shalt.err (!%p4644_p1)
}
  0x23   :  { %s4746_s1 = smov 128   ;;  %s4747_s16 = smov 8  }
  0x24   :  { %55 = dma.hbm_to_vmem [thread:$0]  %s5696_s3, 2048, %s4785_s21, [#allocation9], %s4746_s1, %s4746_s1, %s4747_s16  }
  0x25   :  { %s4748_s19 = smov [#allocation2]   ;;  %s4749_s22 = smov [#allocation7]  }
  0x26   :  { %s20_s20 = sshll.u32 %s4748_s19, 4  ;;  %s40_s23 = sshll.u32 %s4749_s22, 4  ;;  %s21_s20 = int_to_ptr.vmem [resolvable:$true] %s20_s20  ;;  %s41_s23 = int_to_ptr.vmem [resolvable:$true] %s40_s23 }
  0x27   :  { %s4648_s26 = scalar_lea.hbm %s5693_s0, 64 }
  0x28   :  { %p4649_p2 = scmp.ne.s32.totalorder %s5693_s0, %s4648_s26  ;;  %p4652_p3 = scmp.lt.u32.totalorder %s4648_s26, %s5693_s0 }
  0x2a   :  { %p4654_p4 = pnand %p4652_p3, %p4649_p2 }
  0x2c   :  { %4657 = shalt.err (!%p4654_p4)
}
  0x2d   :  { %s4658_s3 = scalar_lea.vmem %s21_s20, 64  ;;  %p4663_p6 = scmp.lt.s32.totalorder %s21_s20, %s21_s20 }
  0x2e   :  { %p4659_p5 = scmp.ne.s32.totalorder %s21_s20, %s4658_s3  ;;  %p4664_p7 = scmp.lt.s32.totalorder %s4658_s3, %s4658_s3 }
  0x30   :  { %p4665_p8 = por %p4664_p7, %p4663_p6 }
  0x32   :  { %p4666_p9 = pnand %p4665_p8, %p4659_p5 }
  0x34   :  { %4669 = shalt.err (!%p4666_p9)
}
  0x35   :  { %23 = dma.hbm_to_vmem [thread:$0]  %s5693_s0, 64, %s21_s20, [#allocation3]  }
  0x36   :  { %s4670_s9 = scalar_lea.hbm %s5695_s2, 16 }
  0x37   :  { %p4671_p10 = scmp.ne.s32.totalorder %s5695_s2, %s4670_s9  ;;  %p4674_p11 = scmp.lt.u32.totalorder %s4670_s9, %s5695_s2 }
  0x39   :  { %p4676_p12 = pnand %p4674_p11, %p4671_p10 }
  0x3b   :  { %4679 = shalt.err (!%p4676_p12)
}
  0x3c   :  { %s4680_s14 = scalar_lea.vmem %s41_s23, 16  ;;  %s4684_s15 = scalar_lea.vmem %s41_s23, 32 }
  0x3d   :  { %p4681_p13 = scmp.ne.s32.totalorder %s41_s23, %s4680_s14  ;;  %p4685_p0 = scmp.lt.s32.totalorder %s41_s23, %s41_s23 }
  0x3e   :  { %p4686_p1 = scmp.lt.s32.totalorder %s4684_s15, %s4680_s14 }
  0x40   :  { %p4687_p2 = por %p4686_p1, %p4685_p0 }
  0x42   :  { %p4688_p3 = pnand %p4687_p2, %p4681_p13 }
  0x44   :  { %4691 = shalt.err (!%p4688_p3)
}
  0x45   :  { %43 = dma.hbm_to_vmem [thread:$0]  %s5695_s2, 16, %s41_s23, [#allocation6]  }
  0x46   :  { %s4750_s18 = smov [#allocation10]   ;;  %s4692_s24 = scalar_lea.hbm %s5697_s4, 2048 }
  0x47   :  { %s61_s19 = sshll.u32 %s4750_s18, 4  ;;  %p4693_p4 = scmp.ne.s32.totalorder %s5697_s4, %s4692_s24  ;;  %s62_s19 = int_to_ptr.vmem [resolvable:$true] %s61_s19 }
  0x48   :  { %p4696_p5 = scmp.lt.u32.totalorder %s4692_s24, %s5697_s4 }
  0x4a   :  { %p4698_p6 = pnand %p4696_p5, %p4693_p4 }
  0x4c   :  { %4701 = shalt.err (!%p4698_p6)
}
  0x4d   :  { %s4702_s29 = scalar_lea.vmem %s62_s19, 2048  ;;  %p4707_p8 = scmp.lt.s32.totalorder %s62_s19, %s62_s19 }
  0x4e   :  { %p4703_p7 = scmp.ne.s32.totalorder %s62_s19, %s4702_s29  ;;  %p4708_p9 = scmp.lt.s32.totalorder %s4702_s29, %s4702_s29 }
  0x50   :  { %p4709_p10 = por %p4708_p9, %p4707_p8 }
  0x52   :  { %p4710_p11 = pnand %p4709_p10, %p4703_p7 }
  0x54   :  { %4713 = shalt.err (!%p4710_p11)
}
  0x55   :  { %67 = dma.hbm_to_vmem [thread:$0]  %s5697_s4, 2048, %s62_s19, [#allocation9], %s4746_s1, %s4746_s1, %s4747_s16  }
  0x56   :  { %4736 = dma.done.wait [#allocation3], 64  }
  0x57   :  { %4737 = vsyncadd [#allocation3], 4294967232 }
  0x58   :  { %4738 = dma.done.wait [#allocation6], 32  }
  0x59   :  { %4739 = vsyncadd [#allocation6], 4294967264 }
  0x5a   :  { %4740 = dma.done.wait [#allocation9], 4096  }
  0x5b   :  { %4741 = vsyncadd [#allocation9], 4294963200  ;;  %v4751_v0 = vmov 0.0|0.0   ;;  %vm4752_vm0 = vmmov 0   ;;  %v4753_v1 = vmov 0.0   ;;  %v84_v2 = vld [vmem:[#allocation8] sm:$0xff] }
  0x5c   :  { %3974 = vmatprep.subr.bf16.mxu0 %v4751_v0  ;;  %4118 = vmatprep.subr.bf16.mxu1 %v4751_v0  ;;  %v85_v3 = vld [vmem:[#allocation8 + $0x8] sm:$0xff]  ;;  %v86_v4 = vld [vmem:[#allocation8 + $0x10] sm:$0xff]  ;;  %v117_v5 = vand.u32 4294901760, %v84_v2  ;;  %v87_v7 = vld [vmem:[#allocation8 + $0x18] sm:$0xff]  ;;  %s4754_s4 = smov [#allocation11]  }
  0x5d   :  { %3166 = vmatprep.mubr.msk.f32.mxu0 %vm4752_vm0, %v4753_v1  ;;  %3376 = vmatprep.mubr.msk.f32.mxu1 %vm4752_vm0, %v4753_v1  ;;  %v120_v6 = vand.u32 4294901760, %v85_v3  ;;  %v123_v8 = vand.u32 4294901760, %v86_v4  ;;  %v126_v9 = vand.u32 4294901760, %v87_v7  ;;  %v4864_v10 = vld [vmem:[#allocation8 + $0x20] sm:$0xff]  ;;  %v4866_v11 = vld [vmem:[#allocation8 + $0x28] sm:$0xff]  ;;  %v4878_v16 = vld [vmem:[#allocation8 + $0x30] sm:$0xff] }
  0x5e   :  { %v129_v14 = vand.u32 4294901760, %v4864_v10  ;;  %v132_v15 = vand.u32 4294901760, %v4866_v11  ;;  %v4880_v17 = vld [vmem:[#allocation8 + $0x38] sm:$0xff]  ;;  %v135_v20 = vand.u32 4294901760, %v4878_v16  ;;  %v92_v22 = vld [vmem:[#allocation8 + $0x40] sm:$0xff]  ;;  %v93_v23 = vld [vmem:[#allocation8 + $0x48] sm:$0xff]  ;;  %v4896_v35 = vsub.f32 %v84_v2, %v117_v5 }
  0x5f   :  { %v4868_v12 = vpack.c.bf16 %v120_v6, %v117_v5  ;;  %v4872_v13 = vpack.c.bf16 %v126_v9, %v123_v8  ;;  %v83_v18 = vld [vmem:[#allocation2] sm:$0xf]  ;;  %v138_v21 = vand.u32 4294901760, %v4880_v17  ;;  %v94_v26 = vld [vmem:[#allocation8 + $0x50] sm:$0xff]  ;;  %v96_v28 = vld [vmem:[#allocation8 + $0x60] sm:$0xff]  ;;  %v141_v30 = vand.u32 4294901760, %v92_v22 }
  0x60   :  { %v4884_v19 = vpack.c.bf16 %v132_v15, %v129_v14  ;;  %v4890_v24 = vand.u32 4294901760, %v83_v18  ;;  %v757_v25 = vmul.f32 %v83_v18, %v83_v18  ;;  %v95_v27 = vld [vmem:[#allocation8 + $0x58] sm:$0xff]  ;;  %v144_v31 = vand.u32 4294901760, %v93_v23  ;;  %v97_v32 = vld [vmem:[#allocation8 + $0x68] sm:$0xff]  ;;  %v98_v33 = vld [vmem:[#allocation8 + $0x70] sm:$0xff]  ;;  %s2713_s1 = sshll.u32 %s4754_s4, 4  ;;  %s2714_s1 = int_to_ptr.vmem [resolvable:$true] %s2713_s1 }
  0x61   :  { %3976 = vmatpush3.bf16.msra.mxu0 %v4868_v12  ;;  %4120 = vmatpush3.bf16.msra.mxu1 %v4868_v12  ;;  %v4894_v29 = vpack.c.bf16 %v138_v21, %v135_v20  ;;  %v99_v34 = vld [vmem:[#allocation8 + $0x78] sm:$0xff]  ;;  %v4903_v37 = vsub.f32 %v85_v3, %v120_v6  ;;  %v4905_v38 = vsub.f32 %v86_v4, %v123_v8  ;;  %v147_v39 = vand.u32 4294901760, %v94_v26  ;;  %s4714_s16 = scalar_lea.vmem %s2714_s1, 64  ;;  %p4719_p13 = scmp.lt.s32.totalorder %s2714_s1, %s2714_s1 }
  0x62   :  { %3977 = vmatprep.subr.bf16.mxu0 %v4751_v0  ;;  %4121 = vmatprep.subr.bf16.mxu1 %v4751_v0  ;;  %v4901_v36 = vsub.f32 %v83_v18, %v4890_v24  ;;  %v150_v40 = vand.u32 4294901760, %v95_v27  ;;  %v4907_v41 = vand.u32 4294901760, %v757_v25  ;;  %v153_v42 = vand.u32 4294901760, %v96_v28  ;;  %p4715_p12 = scmp.ne.s32.totalorder %s2714_s1, %s4714_s16  ;;  %p4720_p0 = scmp.lt.s32.totalorder %s4714_s16, %s4714_s16 }
  0x63   :  { %v156_v43 = vand.u32 4294901760, %v97_v32  ;;  %v159_v44 = vand.u32 4294901760, %v98_v33  ;;  %v162_v45 = vand.u32 4294901760, %v99_v34  ;;  %v4911_v46 = vpack.c.bf16 %v144_v31, %v141_v30 }
  0x64   :  { %v210_v47 = vand.u32 4294901760, %v4896_v35  ;;  %v5700_v48 = vand.u32 4294901760, %v4901_v36  ;;  %v217_v49 = vand.u32 4294901760, %v4903_v37  ;;  %v224_v50 = vand.u32 4294901760, %v4905_v38  ;;  %p4721_p1 = por %p4720_p0, %p4719_p13 }
  0x65   :  { %3979 = vmatpush3.bf16.msra.mxu0 %v4872_v13  ;;  %4123 = vmatpush3.bf16.msra.mxu1 %v4872_v13  ;;  %v4919_v51 = vsub.f32 %v87_v7, %v126_v9  ;;  %v4922_v52 = vsub.f32 %v757_v25, %v4907_v41  ;;  %v4924_v53 = vpack.c.bf16 %v150_v40, %v147_v39 }
  0x66   :  { %3980 = vmatprep.subr.bf16.mxu0 %v4751_v0  ;;  %4124 = vmatprep.subr.bf16.mxu1 %v4751_v0  ;;  %v4926_v54 = vpack.c.bf16 %v156_v43, %v153_v42  ;;  %v4928_v55 = vpack.c.bf16 %v162_v45, %v159_v44  ;;  %v211_v56 = vsub.f32 %v4896_v35, %v210_v47  ;;  %p4722_p2 = pnand %p4721_p1, %p4715_p12 }
  0x67   :  { %v4934_v57 = vsub.f32 %v4864_v10, %v129_v14  ;;  %v4937_v58 = vsub.f32 %v4866_v11, %v132_v15  ;;  %v200_v59 = vsub.f32 %v4901_v36, %v5700_v48  ;;  %v218_v60 = vsub.f32 %v4903_v37, %v217_v49 }
  0x68   :  { %v4946_v61 = vsub.f32 %v4905_v38, %v224_v50  ;;  %v231_v62 = vand.u32 4294901760, %v4919_v51  ;;  %v5699_v63 = vand.u32 4294901760, %v4922_v52  ;;  %v4951_v2 = vsub.f32 %v4878_v16, %v135_v20 }
  0x69   :  { %3982 = vmatpush3.bf16.msra.mxu0 %v4884_v19  ;;  %4126 = vmatpush3.bf16.msra.mxu1 %v4884_v19  ;;  %v4954_v3 = vsub.f32 %v4880_v17, %v138_v21  ;;  %v4956_v4 = vsub.f32 %v92_v22, %v141_v30  ;;  %v4958_v5 = vsub.f32 %v93_v23, %v144_v31  ;;  %v238_v9 = vand.u32 4294901760, %v4934_v57 }
  0x6a   :  { %3983 = vmatprep.subr.bf16.mxu0 %v4751_v0  ;;  %4127 = vmatprep.subr.bf16.mxu1 %v4751_v0  ;;  %v4960_v6 = vsub.f32 %v94_v26, %v147_v39  ;;  %v4962_v7 = vsub.f32 %v95_v27, %v150_v40  ;;  %v4964_v8 = vsub.f32 %v96_v28, %v153_v42  ;;  %v212_v15 = vand.u32 4294901760, %v211_v56 }
  0x6b   :  { %v4969_v10 = vsub.f32 %v97_v32, %v156_v43  ;;  %v4971_v11 = vsub.f32 %v98_v33, %v159_v44  ;;  %v4973_v14 = vsub.f32 %v99_v34, %v162_v45  ;;  %v219_v16 = vand.u32 4294901760, %v218_v60 }
  0x6c   :  { %v232_v17 = vsub.f32 %v4919_v51, %v231_v62  ;;  %v245_v18 = vand.u32 4294901760, %v4937_v58  ;;  %v842_v20 = vsub.f32 %v4922_v52, %v5699_v63  ;;  %v252_v21 = vand.u32 4294901760, %v4951_v2 }
  0x6d   :  { %3985 = vmatpush3.bf16.msra.mxu0 %v4894_v29  ;;  %4129 = vmatpush3.bf16.msra.mxu1 %v4894_v29  ;;  %v259_v22 = vand.u32 4294901760, %v4954_v3  ;;  %v266_v23 = vand.u32 4294901760, %v4956_v4  ;;  %v273_v25 = vand.u32 4294901760, %v4958_v5  ;;  %v280_v26 = vand.u32 4294901760, %v4960_v6 }
  0x6e   :  { %3986 = vmatprep.subr.bf16.mxu0 %v4751_v0  ;;  %4130 = vmatprep.subr.bf16.mxu1 %v4751_v0  ;;  %v287_v27 = vand.u32 4294901760, %v4962_v7  ;;  %v294_v28 = vand.u32 4294901760, %v4964_v8  ;;  %v301_v30 = vand.u32 4294901760, %v4969_v10  ;;  %v308_v31 = vand.u32 4294901760, %v4971_v11 }
  0x6f   :  { %v315_v32 = vand.u32 4294901760, %v4973_v14  ;;  %v4994_v33 = vpack.c.bf16 %v217_v49, %v210_v47  ;;  %v4998_v34 = vpack.c.bf16 %v231_v62, %v224_v50  ;;  %v5000_v39 = vpack.c.bf16 %v245_v18, %v238_v9 }
  0x70   :  { %v5002_v40 = vpack.c.bf16 %v259_v22, %v252_v21  ;;  %v5004_v42 = vpack.c.bf16 %v273_v25, %v266_v23  ;;  %v5006_v43 = vpack.c.bf16 %v287_v27, %v280_v26  ;;  %v5008_v44 = vpack.c.bf16 %v301_v30, %v294_v28 }
  0x71   :  { %3988 = vmatpush3.bf16.msra.mxu0 %v4911_v46  ;;  %4132 = vmatpush3.bf16.msra.mxu1 %v4911_v46  ;;  %v5014_v45 = vpack.c.bf16 %v315_v32, %v308_v31  ;;  %v201_v47 = vand.u32 4294901760, %v200_v59  ;;  %v843_v49 = vand.u32 4294901760, %v842_v20  ;;  %v239_v50 = vsub.f32 %v4934_v57, %v238_v9 }
  0x72   :  { %3989 = vmatprep.subr.bf16.mxu0 %v4751_v0  ;;  %4133 = vmatprep.subr.bf16.mxu1 %v4751_v0  ;;  %v246_v56 = vsub.f32 %v4937_v58, %v245_v18  ;;  %v3999_v60 = vpack.c.bf16 %v219_v16, %v212_v15  ;;  %v226_v62 = vand.u32 4294901760, %v4946_v61  ;;  %v233_v63 = vand.u32 4294901760, %v232_v17 }
  0x73   :  { %v240_v59 = vand.u32 4294901760, %v239_v50  ;;  %v253_v18 = vsub.f32 %v4951_v2, %v252_v21  ;;  %v260_v48 = vsub.f32 %v4954_v3, %v259_v22  ;;  %v274_v17 = vsub.f32 %v4958_v5, %v273_v25 }
  0x74   :  { %v247_v20 = vand.u32 4294901760, %v246_v56  ;;  %v4002_v9 = vpack.c.bf16 %v233_v63, %v226_v62  ;;  %v267_v63 = vsub.f32 %v4956_v4, %v266_v23  ;;  %v281_v21 = vsub.f32 %v4960_v6, %v280_v26 }
  0x75   :  { %3991 = vmatpush3.bf16.msra.mxu0 %v4924_v53  ;;  %4135 = vmatpush3.bf16.msra.mxu1 %v4924_v53  ;;  %v254_v15 = vand.u32 4294901760, %v253_v18  ;;  %v261_v16 = vand.u32 4294901760, %v260_v48  ;;  %v288_v50 = vsub.f32 %v4962_v7, %v287_v27  ;;  %v295_v48 = vsub.f32 %v4964_v8, %v294_v28 }
  0x76   :  { %3992 = vmatprep.subr.bf16.mxu0 %v4751_v0  ;;  %4136 = vmatprep.subr.bf16.mxu1 %v4751_v0  ;;  %v4005_v61 = vpack.c.bf16 %v247_v20, %v240_v59  ;;  %v282_v25 = vand.u32 4294901760, %v281_v21  ;;  %v302_v26 = vsub.f32 %v4969_v10, %v301_v30  ;;  %v309_v28 = vsub.f32 %v4971_v11, %v308_v31 }
  0x77   :  { %v4008_v22 = vpack.c.bf16 %v261_v16, %v254_v15  ;;  %v289_v56 = vand.u32 4294901760, %v288_v50  ;;  %v316_v59 = vsub.f32 %v4973_v14, %v315_v32  ;;  %v4023_v32 = vpack.c.bf16 %v4903_v37, %v4896_v35  ;;  %v112_v16 = vld [vmem:[#allocation10 + $0x60] sm:$0xff] }
  0x78   :  { %v303_v62 = vand.u32 4294901760, %v302_v26  ;;  %v310_v20 = vand.u32 4294901760, %v309_v28  ;;  %v4026_v18 = vpack.c.bf16 %v4919_v51, %v4905_v38  ;;  %v4029_v35 = vpack.c.bf16 %v4937_v58, %v4934_v57 }
  0x79   :  { %3994 = vmatpush3.bf16.msra.mxu0 %v4926_v54  ;;  %4138 = vmatpush3.bf16.msra.mxu1 %v4926_v54  ;;  %v4014_v27 = vpack.c.bf16 %v289_v56, %v282_v25  ;;  %v4032_v37 = vpack.c.bf16 %v4954_v3, %v4951_v2  ;;  %v4035_v38 = vpack.c.bf16 %v4958_v5, %v4956_v4  ;;  %v5705_v2 = vand.u32 4294901760, %v4901_v36  ;;  %v5229_v4 = vld [vmem:[#allocation10 + $0x20] sm:$0xff]  ;;  %v5231_v5 = vld [vmem:[#allocation10 + $0x28] sm:$0xff] }
  0x7a   :  { %3995 = vmatprep.subr.bf16.mxu0 %v4751_v0  ;;  %4139 = vmatprep.subr.bf16.mxu1 %v4751_v0  ;;  %v4038_v51 = vpack.c.bf16 %v4962_v7, %v4960_v6  ;;  %v4041_v57 = vpack.c.bf16 %v4969_v10, %v4964_v8  ;;  %v4044_v58 = vpack.c.bf16 %v4973_v14, %v4971_v11  ;;  %v5706_v3 = vand.u32 4294901760, %v4922_v52  ;;  %v5267_v14 = vld [vmem:[#allocation10 + $0x40] sm:$0xff] }
  0x7b   :  { %v1412_v6 = vand.u32 4294901760, %v5229_v4  ;;  %v1415_v7 = vand.u32 4294901760, %v5231_v5 }
  0x7d   :  { %3997 = vmatpush3.bf16.msra.mxu0 %v4928_v55  ;;  %4141 = vmatpush3.bf16.msra.mxu1 %v4928_v55  ;;  %v5261_v8 = vpack.c.bf16 %v1415_v7, %v1412_v6 }
  0x7e   :  { %3998 = vmatprep.subr.bf16.mxu0 %v4751_v0  ;;  %4142 = vmatprep.subr.bf16.mxu1 %v4751_v0 }
  0x80   :  { %3167 = vmatmul.mubr.f32.vlgmr.msra.gmra.mrb[0].mxu0 %v201_v47  ;;  %3377 = vmatmul.mubr.f32.vlgmr.msra.gmra.mrb[0].mxu1 %v843_v49  ;;  %v268_v47 = vand.u32 4294901760, %v267_v63  ;;  %v275_v49 = vand.u32 4294901760, %v274_v17  ;;  %v113_v63 = vld [vmem:[#allocation10 + $0x68] sm:$0xff]  ;;  %v1436_v17 = vand.u32 4294901760, %v112_v16 }
  0x81   :  { %4000 = vmatpush3.bf16.msra.mxu0 %v3999_v60  ;;  %4144 = vmatpush3.bf16.msra.mxu1 %v3999_v60  ;;  %v296_v60 = vand.u32 4294901760, %v295_v48  ;;  %v1439_v21 = vand.u32 4294901760, %v113_v63 }
  0x82   :  { %4001 = vmatprep.subr.bf16.mxu0 %v4751_v0  ;;  %4145 = vmatprep.subr.bf16.mxu1 %v4751_v0  ;;  %v4011_v23 = vpack.c.bf16 %v275_v49, %v268_v47  ;;  %v114_v47 = vld [vmem:[#allocation10 + $0x70] sm:$0xff]  ;;  %v115_v49 = vld [vmem:[#allocation10 + $0x78] sm:$0xff]  ;;  %v5325_v25 = vsub.f32 %v112_v16, %v1436_v17 }
  0x83   :  { %3201 = vmatprep.mubr.msk.f32.mxu0 %vm4752_vm0, %v4753_v1  ;;  %3411 = vmatprep.mubr.msk.f32.mxu1 %vm4752_vm0, %v4753_v1  ;;  %v4017_v30 = vpack.c.bf16 %v303_v62, %v296_v60  ;;  %v1442_v50 = vand.u32 4294901760, %v114_v47  ;;  %v1445_v48 = vand.u32 4294901760, %v115_v49  ;;  %v5327_v56 = vsub.f32 %v113_v63, %v1439_v21 }
  0x84   :  { %v5704_v26 = vand.u32 4294901760, %v5325_v25 }
  0x85   :  { %4003 = vmatpush3.bf16.msra.mxu0 %v4002_v9  ;;  %4147 = vmatpush3.bf16.msra.mxu1 %v4002_v9  ;;  %v317_v9 = vand.u32 4294901760, %v316_v59  ;;  %v5703_v60 = vand.u32 4294901760, %v5327_v56  ;;  %v5334_v62 = vsub.f32 %v114_v47, %v1442_v50  ;;  %v5336_v28 = vsub.f32 %v115_v49, %v1445_v48 }
  0x86   :  { %4004 = vmatprep.subr.bf16.mxu0 %v4751_v0  ;;  %4148 = vmatprep.subr.bf16.mxu1 %v4751_v0 }
  0x87   :  { %v4020_v31 = vpack.c.bf16 %v317_v9, %v310_v20  ;;  %v1585_v59 = vsub.f32 %v5327_v56, %v5703_v60  ;;  %v5702_v20 = vand.u32 4294901760, %v5334_v62  ;;  %v5701_v9 = vand.u32 4294901760, %v5336_v28 }
  0x89   :  { %4006 = vmatpush3.bf16.msra.mxu0 %v4005_v61  ;;  %4150 = vmatpush3.bf16.msra.mxu1 %v4005_v61 }
  0x8a   :  { %4007 = vmatprep.subr.bf16.mxu0 %v4751_v0  ;;  %4151 = vmatprep.subr.bf16.mxu1 %v4751_v0 }
  0x8d   :  { %4009 = vmatpush3.bf16.msra.mxu0 %v4008_v22  ;;  %4153 = vmatpush3.bf16.msra.mxu1 %v4008_v22  ;;  %v5313_v22 = vpack.c.bf16 %v1439_v21, %v1436_v17 }
  0x8e   :  { %4010 = vmatprep.subr.bf16.mxu0 %v4751_v0  ;;  %4154 = vmatprep.subr.bf16.mxu1 %v4751_v0 }
  0x91   :  { %4012 = vmatpush3.bf16.msra.mxu0 %v4011_v23  ;;  %4156 = vmatpush3.bf16.msra.mxu1 %v4011_v23  ;;  %v5319_v23 = vpack.c.bf16 %v1445_v48, %v1442_v50 }
  0x92   :  { %4013 = vmatprep.subr.bf16.mxu0 %v4751_v0  ;;  %4157 = vmatprep.subr.bf16.mxu1 %v4751_v0 }
  0x95   :  { %4015 = vmatpush3.bf16.msra.mxu0 %v4014_v27  ;;  %4159 = vmatpush3.bf16.msra.mxu1 %v4014_v27  ;;  %v1578_v27 = vsub.f32 %v5325_v25, %v5704_v26 }
  0x96   :  { %4016 = vmatprep.subr.bf16.mxu0 %v4751_v0  ;;  %4160 = vmatprep.subr.bf16.mxu1 %v4751_v0 }
  0x99   :  { %4018 = vmatpush3.bf16.msra.mxu0 %v4017_v30  ;;  %4162 = vmatpush3.bf16.msra.mxu1 %v4017_v30  ;;  %v1579_v30 = vand.u32 4294901760, %v1578_v27 }
  0x9a   :  { %4019 = vmatprep.subr.bf16.mxu0 %v4751_v0  ;;  %4163 = vmatprep.subr.bf16.mxu1 %v4751_v0 }
  0x9d   :  { %4021 = vmatpush3.bf16.msra.mxu0 %v4020_v31  ;;  %4165 = vmatpush3.bf16.msra.mxu1 %v4020_v31  ;;  %v1586_v31 = vand.u32 4294901760, %v1585_v59 }
  0x9e   :  { %4022 = vmatprep.subr.bf16.mxu0 %v4751_v0  ;;  %4166 = vmatprep.subr.bf16.mxu1 %v4751_v0 }
  0xa0   :  { %3202 = vmatmul.mubr.f32.vlgmr.msra.gmra.mrb[0].mxu0 %v4890_v24  ;;  %3412 = vmatmul.mubr.f32.vlgmr.msra.gmra.mrb[0].mxu1 %v4907_v41 }
  0xa1   :  { %4024 = vmatpush3.bf16.msra.mxu0 %v4023_v32  ;;  %4168 = vmatpush3.bf16.msra.mxu1 %v4023_v32  ;;  %v1592_v32 = vsub.f32 %v5334_v62, %v5702_v20 }
  0xa2   :  { %4025 = vmatprep.subr.bf16.mxu0 %v4751_v0  ;;  %4169 = vmatprep.subr.bf16.mxu1 %v4751_v0 }
  0xa3   :  { %3236 = vmatprep.mubr.msk.f32.mxu0 %vm4752_vm0, %v4753_v1  ;;  %3446 = vmatprep.mubr.msk.f32.mxu1 %vm4752_vm0, %v4753_v1 }
  0xa5   :  { %4027 = vmatpush3.bf16.msra.mxu0 %v4026_v18  ;;  %4171 = vmatpush3.bf16.msra.mxu1 %v4026_v18  ;;  %v1599_v18 = vsub.f32 %v5336_v28, %v5701_v9 }
  0xa6   :  { %4028 = vmatprep.subr.bf16.mxu0 %v4751_v0  ;;  %4172 = vmatprep.subr.bf16.mxu1 %v4751_v0 }
  0xa9   :  { %4030 = vmatpush3.bf16.msra.mxu0 %v4029_v35  ;;  %4174 = vmatpush3.bf16.msra.mxu1 %v4029_v35  ;;  %v5349_v35 = vpack.c.bf16 %v1586_v31, %v1579_v30 }
  0xaa   :  { %4031 = vmatprep.subr.bf16.mxu0 %v4751_v0  ;;  %4175 = vmatprep.subr.bf16.mxu1 %v4751_v0 }
  0xad   :  { %4033 = vmatpush3.bf16.msra.mxu0 %v4032_v37  ;;  %4177 = vmatpush3.bf16.msra.mxu1 %v4032_v37  ;;  %v1593_v37 = vand.u32 4294901760, %v1592_v32 }
  0xae   :  { %4034 = vmatprep.subr.bf16.mxu0 %v4751_v0  ;;  %4178 = vmatprep.subr.bf16.mxu1 %v4751_v0 }
  0xb1   :  { %4036 = vmatpush3.bf16.msra.mxu0 %v4035_v38  ;;  %4180 = vmatpush3.bf16.msra.mxu1 %v4035_v38  ;;  %v1600_v38 = vand.u32 4294901760, %v1599_v18 }
  0xb2   :  { %4037 = vmatprep.subr.bf16.mxu0 %v4751_v0  ;;  %4181 = vmatprep.subr.bf16.mxu1 %v4751_v0 }
  0xb5   :  { %4039 = vmatpush3.bf16.msra.mxu0 %v4038_v51  ;;  %4183 = vmatpush3.bf16.msra.mxu1 %v4038_v51  ;;  %v5351_v51 = vpack.c.bf16 %v1600_v38, %v1593_v37 }
  0xb6   :  { %4040 = vmatprep.subr.bf16.mxu0 %v4751_v0  ;;  %4184 = vmatprep.subr.bf16.mxu1 %v4751_v0 }
  0xb9   :  { %4042 = vmatpush3.bf16.msra.mxu0 %v4041_v57  ;;  %4186 = vmatpush3.bf16.msra.mxu1 %v4041_v57  ;;  %v5355_v57 = vpack.c.bf16 %v5327_v56, %v5325_v25 }
  0xba   :  { %4043 = vmatprep.subr.bf16.mxu0 %v4751_v0  ;;  %4187 = vmatprep.subr.bf16.mxu1 %v4751_v0 }
  0xbd   :  { %4045 = vmatpush3.bf16.msra.mxu0 %v4044_v58  ;;  %4189 = vmatpush3.bf16.msra.mxu1 %v4044_v58  ;;  %v5359_v58 = vpack.c.bf16 %v5336_v28, %v5334_v62 }
  0xbe   :  { %4046 = vmatprep.subr.bf16.mxu0 %v4751_v0  ;;  %4190 = vmatprep.subr.bf16.mxu1 %v4751_v0 }
  0xc0   :  { %3237 = vmatmul.mubr.f32.vlgmr.msra.gmra.mrb[0].mxu0 %v4901_v36  ;;  %3447 = vmatmul.mubr.f32.vlgmr.msra.gmra.mrb[0].mxu1 %v4922_v52  ;;  %v5213_v36 = vld [vmem:[#allocation10 + $0x10] sm:$0xff] }
  0xc1   :  { %4048 = vmatpush3.bf16.msra.mxu0 %v4868_v12  ;;  %4192 = vmatpush3.bf16.msra.mxu1 %v4868_v12 }
  0xc2   :  { %4049 = vmatprep.subr.bf16.mxu0 %v4751_v0  ;;  %4193 = vmatprep.subr.bf16.mxu1 %v4751_v0 }
  0xc3   :  { %3271 = vmatprep.mubr.msk.f32.mxu0 %vm4752_vm0, %v4753_v1  ;;  %3481 = vmatprep.mubr.msk.f32.mxu1 %vm4752_vm0, %v4753_v1 }
  0xc5   :  { %4051 = vmatpush3.bf16.msra.mxu0 %v4872_v13  ;;  %4195 = vmatpush3.bf16.msra.mxu1 %v4872_v13 }
  0xc6   :  { %4052 = vmatprep.subr.bf16.mxu0 %v4751_v0  ;;  %4196 = vmatprep.subr.bf16.mxu1 %v4751_v0 }
  0xc9   :  { %4054 = vmatpush3.bf16.msra.mxu0 %v4884_v19  ;;  %4198 = vmatpush3.bf16.msra.mxu1 %v4884_v19 }
  0xca   :  { %4055 = vmatprep.subr.bf16.mxu0 %v4751_v0  ;;  %4199 = vmatprep.subr.bf16.mxu1 %v4751_v0 }
  0xcd   :  { %4057 = vmatpush3.bf16.msra.mxu0 %v4894_v29  ;;  %4201 = vmatpush3.bf16.msra.mxu1 %v4894_v29 }
  0xce   :  { %4058 = vmatprep.subr.bf16.mxu0 %v4751_v0  ;;  %4202 = vmatprep.subr.bf16.mxu1 %v4751_v0 }
  0xd1   :  { %4060 = vmatpush3.bf16.msra.mxu0 %v4911_v46  ;;  %4204 = vmatpush3.bf16.msra.mxu1 %v4911_v46 }
  0xd2   :  { %4061 = vmatprep.subr.bf16.mxu0 %v4751_v0  ;;  %4205 = vmatprep.subr.bf16.mxu1 %v4751_v0 }
  0xd5   :  { %4063 = vmatpush3.bf16.msra.mxu0 %v4924_v53  ;;  %4207 = vmatpush3.bf16.msra.mxu1 %v4924_v53 }
  0xd6   :  { %4064 = vmatprep.subr.bf16.mxu0 %v4751_v0  ;;  %4208 = vmatprep.subr.bf16.mxu1 %v4751_v0 }
  0xd9   :  { %4066 = vmatpush3.bf16.msra.mxu0 %v4926_v54  ;;  %4210 = vmatpush3.bf16.msra.mxu1 %v4926_v54 }
  0xda   :  { %4067 = vmatprep.subr.bf16.mxu0 %v4751_v0  ;;  %4211 = vmatprep.subr.bf16.mxu1 %v4751_v0 }
  0xdd   :  { %4069 = vmatpush3.bf16.msra.mxu0 %v4928_v55  ;;  %4213 = vmatpush3.bf16.msra.mxu1 %v4928_v55 }
  0xde   :  { %4070 = vmatprep.subr.bf16.mxu0 %v4751_v0  ;;  %4214 = vmatprep.subr.bf16.mxu1 %v4751_v0 }
  0xe0   :  { %3272 = vmatmul.mubr.f32.vlgmr.msra.gmra.mrb[0].mxu0 %v5705_v2  ;;  %3482 = vmatmul.mubr.f32.vlgmr.msra.gmra.mrb[0].mxu1 %v5706_v3 }
  0xe1   :  { %4072 = vmatpush3.bf16.msra.mxu0 %v4994_v33  ;;  %4216 = vmatpush3.bf16.msra.mxu1 %v4994_v33  ;;  %v5269_v33 = vld [vmem:[#allocation10 + $0x48] sm:$0xff] }
  0xe2   :  { %4073 = vmatprep.subr.bf16.mxu0 %v4751_v0  ;;  %4217 = vmatprep.subr.bf16.mxu1 %v4751_v0 }
  0xe3   :  { %3306 = vmatprep.mubr.msk.f32.mxu0 %vm4752_vm0, %v4753_v1  ;;  %3516 = vmatprep.mubr.msk.f32.mxu1 %vm4752_vm0, %v4753_v1 }
  0xe5   :  { %4075 = vmatpush3.bf16.msra.mxu0 %v4998_v34  ;;  %4219 = vmatpush3.bf16.msra.mxu1 %v4998_v34 }
  0xe6   :  { %4076 = vmatprep.subr.bf16.mxu0 %v4751_v0  ;;  %4220 = vmatprep.subr.bf16.mxu1 %v4751_v0 }
  0xe9   :  { %4078 = vmatpush3.bf16.msra.mxu0 %v5000_v39  ;;  %4222 = vmatpush3.bf16.msra.mxu1 %v5000_v39  ;;  %v1424_v39 = vand.u32 4294901760, %v5267_v14 }
  0xea   :  { %4079 = vmatprep.subr.bf16.mxu0 %v4751_v0  ;;  %4223 = vmatprep.subr.bf16.mxu1 %v4751_v0 }
  0xed   :  { %4081 = vmatpush3.bf16.msra.mxu0 %v5002_v40  ;;  %4225 = vmatpush3.bf16.msra.mxu1 %v5002_v40  ;;  %v1427_v40 = vand.u32 4294901760, %v5269_v33 }
  0xee   :  { %4082 = vmatprep.subr.bf16.mxu0 %v4751_v0  ;;  %4226 = vmatprep.subr.bf16.mxu1 %v4751_v0 }
  0xf1   :  { %4084 = vmatpush3.bf16.msra.mxu0 %v5004_v42  ;;  %4228 = vmatpush3.bf16.msra.mxu1 %v5004_v42  ;;  %v5283_v42 = vld [vmem:[#allocation10 + $0x50] sm:$0xff] }
  0xf2   :  { %4085 = vmatprep.subr.bf16.mxu0 %v4751_v0  ;;  %4229 = vmatprep.subr.bf16.mxu1 %v4751_v0 }
  0xf5   :  { %4087 = vmatpush3.bf16.msra.mxu0 %v5006_v43  ;;  %4231 = vmatpush3.bf16.msra.mxu1 %v5006_v43  ;;  %v5285_v43 = vld [vmem:[#allocation10 + $0x58] sm:$0xff] }
  0xf6   :  { %4088 = vmatprep.subr.bf16.mxu0 %v4751_v0  ;;  %4232 = vmatprep.subr.bf16.mxu1 %v4751_v0  ;;  %v1433_v61 = vand.u32 4294901760, %v5285_v43 }
  0xf9   :  { %4090 = vmatpush3.bf16.msra.mxu0 %v5008_v44  ;;  %4234 = vmatpush3.bf16.msra.mxu1 %v5008_v44  ;;  %v5293_v44 = vpack.c.bf16 %v1427_v40, %v1424_v39 }
  0xfa   :  { %4091 = vmatprep.subr.bf16.mxu0 %v4751_v0  ;;  %4235 = vmatprep.subr.bf16.mxu1 %v4751_v0 }
  0xfd   :  { %4093 = vmatpush3.bf16.msra.mxu0 %v5014_v45  ;;  %4237 = vmatpush3.bf16.msra.mxu1 %v5014_v45  ;;  %v1430_v45 = vand.u32 4294901760, %v5283_v42 }
  0xfe   :  { %4094 = vmatprep.subr.bf16.mxu0 %v4751_v0  ;;  %4238 = vmatprep.subr.bf16.mxu1 %v4751_v0 }
  0xff   :  { %v5305_v15 = vpack.c.bf16 %v1433_v61, %v1430_v45 }
 0x100   :  { %3307 = vmatmul.mubr.f32.vlgmr.msra.gmra.mrb[0].mxu0 %v4890_v24  ;;  %3517 = vmatmul.mubr.f32.vlgmr.msra.gmra.mrb[0].mxu1 %v4907_v41 }
 0x101   :  { %4096 = vmatpush3.bf16.msra.mxu0 %v4868_v12  ;;  %4240 = vmatpush3.bf16.msra.mxu1 %v4868_v12  ;;  %v5203_v12 = vld [vmem:[#allocation10] sm:$0xff] }
 0x102   :  { %4097 = vmatprep.subr.bf16.mxu0 %v4751_v0  ;;  %4241 = vmatprep.subr.bf16.mxu1 %v4751_v0 }
 0x103   :  { %3341 = vmatprep.mubr.msk.f32.mxu0 %vm4752_vm0, %v4753_v1  ;;  %3551 = vmatprep.mubr.msk.f32.mxu1 %vm4752_vm0, %v4753_v1 }
 0x105   :  { %4099 = vmatpush3.bf16.msra.mxu0 %v4872_v13  ;;  %4243 = vmatpush3.bf16.msra.mxu1 %v4872_v13  ;;  %v5205_v13 = vld [vmem:[#allocation10 + $0x8] sm:$0xff] }
 0x106   :  { %4100 = vmatprep.subr.bf16.mxu0 %v4751_v0  ;;  %4244 = vmatprep.subr.bf16.mxu1 %v4751_v0 }
 0x109   :  { %4102 = vmatpush3.bf16.msra.mxu0 %v4884_v19  ;;  %4246 = vmatpush3.bf16.msra.mxu1 %v4884_v19  ;;  %v1400_v19 = vand.u32 4294901760, %v5203_v12 }
 0x10a   :  { %4103 = vmatprep.subr.bf16.mxu0 %v4751_v0  ;;  %4247 = vmatprep.subr.bf16.mxu1 %v4751_v0 }
 0x10b   :  { %v5364_v2 = vsub.f32 %v5203_v12, %v1400_v19 }
 0x10d   :  { %4105 = vmatpush3.bf16.msra.mxu0 %v4894_v29  ;;  %4249 = vmatpush3.bf16.msra.mxu1 %v4894_v29  ;;  %v1403_v29 = vand.u32 4294901760, %v5205_v13  ;;  %v1493_v17 = vand.u32 4294901760, %v5364_v2 }
 0x10e   :  { %4106 = vmatprep.subr.bf16.mxu0 %v4751_v0  ;;  %4250 = vmatprep.subr.bf16.mxu1 %v4751_v0 }
 0x10f   :  { %v5223_v52 = vpack.c.bf16 %v1403_v29, %v1400_v19  ;;  %v5369_v3 = vsub.f32 %v5205_v13, %v1403_v29  ;;  %v5388_v13 = vsub.f32 %v5229_v4, %v1412_v6  ;;  %v5393_v29 = vsub.f32 %v5231_v5, %v1415_v7 }
 0x111   :  { %4108 = vmatpush3.bf16.msra.mxu0 %v4911_v46  ;;  %4252 = vmatpush3.bf16.msra.mxu1 %v4911_v46  ;;  %v5215_v46 = vld [vmem:[#allocation10 + $0x18] sm:$0xff]  ;;  %v1500_v12 = vand.u32 4294901760, %v5369_v3  ;;  %v1521_v50 = vand.u32 4294901760, %v5388_v13  ;;  %v1528_v48 = vand.u32 4294901760, %v5393_v29 }
 0x112   :  { %4109 = vmatprep.subr.bf16.mxu0 %v4751_v0  ;;  %4253 = vmatprep.subr.bf16.mxu1 %v4751_v0 }
 0x115   :  { %4111 = vmatpush3.bf16.msra.mxu0 %v4924_v53  ;;  %4255 = vmatpush3.bf16.msra.mxu1 %v4924_v53  ;;  %v1406_v53 = vand.u32 4294901760, %v5213_v36 }
 0x116   :  { %4112 = vmatprep.subr.bf16.mxu0 %v4751_v0  ;;  %4256 = vmatprep.subr.bf16.mxu1 %v4751_v0 }
 0x117   :  { %v5374_v16 = vsub.f32 %v5213_v36, %v1406_v53 }
 0x119   :  { %4114 = vmatpush3.bf16.msra.mxu0 %v4926_v54  ;;  %4258 = vmatpush3.bf16.msra.mxu1 %v4926_v54  ;;  %v1409_v54 = vand.u32 4294901760, %v5215_v46  ;;  %v1507_v19 = vand.u32 4294901760, %v5374_v16 }
 0x11a   :  { %4115 = vmatprep.subr.bf16.mxu0 %v4751_v0  ;;  %4259 = vmatprep.subr.bf16.mxu1 %v4751_v0 }
 0x11b   :  { %v5379_v63 = vsub.f32 %v5215_v46, %v1409_v54  ;;  %v1508_v5 = vsub.f32 %v5374_v16, %v1507_v19 }
 0x11d   :  { %4117 = vmatpush3.bf16.msra.mxu0 %v4928_v55  ;;  %4261 = vmatpush3.bf16.msra.mxu1 %v4928_v55  ;;  %v5241_v55 = vpack.c.bf16 %v1409_v54, %v1406_v53  ;;  %v1514_v21 = vand.u32 4294901760, %v5379_v63  ;;  %v1494_v53 = vsub.f32 %v5364_v2, %v1493_v17  ;;  %v1501_v54 = vsub.f32 %v5369_v3, %v1500_v12 }
 0x11e   :  { %4262 = vmatprep.subr.bf16.mxu0 %v4751_v0  ;;  %4406 = vmatprep.subr.bf16.mxu1 %v4751_v0 }
 0x11f   :  { %v1515_v7 = vsub.f32 %v5379_v63, %v1514_v21  ;;  %v1495_v32 = vand.u32 4294901760, %v1494_v53  ;;  %v1502_v18 = vand.u32 4294901760, %v1501_v54 }
 0x120   :  { %3342 = vmatmul.mubr.f32.vlgmr.msra.gmra.mrb[0].mxu0 %v4890_v24  ;;  %3552 = vmatmul.mubr.f32.vlgmr.msra.gmra.mrb[0].mxu1 %v4907_v41  ;;  %v5247_v24 = vld [vmem:[#allocation10 + $0x30] sm:$0xff]  ;;  %v5249_v41 = vld [vmem:[#allocation10 + $0x38] sm:$0xff] }
 0x121   :  { %4264 = vmatpush3.bf16.msra.mxu0 %v5223_v52  ;;  %4408 = vmatpush3.bf16.msra.mxu1 %v5223_v52  ;;  %v1418_v10 = vand.u32 4294901760, %v5247_v24  ;;  %v1421_v11 = vand.u32 4294901760, %v5249_v41  ;;  %v4287_v54 = vpack.c.bf16 %v1502_v18, %v1495_v32 }
 0x122   :  { %4265 = vmatprep.subr.bf16.mxu0 %v4751_v0  ;;  %4409 = vmatprep.subr.bf16.mxu1 %v4751_v0 }
 0x123   :  { %3586 = vmatprep.mubr.msk.f32.mxu0 %vm4752_vm0, %v4753_v1  ;;  %3796 = vmatprep.mubr.msk.f32.mxu1 %vm4752_vm0, %v4753_v1  ;;  %v5277_v34 = vpack.c.bf16 %v1421_v11, %v1418_v10  ;;  %v5422_v30 = vsub.f32 %v5247_v24, %v1418_v10  ;;  %v5427_v31 = vsub.f32 %v5249_v41, %v1421_v11 }
 0x124   :  { %v1529_v24 = vsub.f32 %v5393_v29, %v1528_v48 }
 0x125   :  { %4267 = vmatpush3.bf16.msra.mxu0 %v5241_v55  ;;  %4411 = vmatpush3.bf16.msra.mxu1 %v5241_v55  ;;  %v1535_v11 = vand.u32 4294901760, %v5422_v30  ;;  %v1542_v53 = vand.u32 4294901760, %v5427_v31 }
 0x126   :  { %4268 = vmatprep.subr.bf16.mxu0 %v4751_v0  ;;  %4412 = vmatprep.subr.bf16.mxu1 %v4751_v0  ;;  %v1530_v26 = vand.u32 4294901760, %v1529_v24 }
 0x127   :  { %v1536_v32 = vsub.f32 %v5422_v30, %v1535_v11 }
 0x129   :  { %4270 = vmatpush3.bf16.msra.mxu0 %v5261_v8  ;;  %4414 = vmatpush3.bf16.msra.mxu1 %v5261_v8 }
 0x12a   :  { %4271 = vmatprep.subr.bf16.mxu0 %v4751_v0  ;;  %4415 = vmatprep.subr.bf16.mxu1 %v4751_v0 }
 0x12d   :  { %4273 = vmatpush3.bf16.msra.mxu0 %v5277_v34  ;;  %4417 = vmatpush3.bf16.msra.mxu1 %v5277_v34 }
 0x12e   :  { %4274 = vmatprep.subr.bf16.mxu0 %v4751_v0  ;;  %4418 = vmatprep.subr.bf16.mxu1 %v4751_v0 }
 0x131   :  { %4276 = vmatpush3.bf16.msra.mxu0 %v5293_v44  ;;  %4420 = vmatpush3.bf16.msra.mxu1 %v5293_v44 }
 0x132   :  { %4277 = vmatprep.subr.bf16.mxu0 %v4751_v0  ;;  %4421 = vmatprep.subr.bf16.mxu1 %v4751_v0 }
 0x135   :  { %4279 = vmatpush3.bf16.msra.mxu0 %v5305_v15  ;;  %4423 = vmatpush3.bf16.msra.mxu1 %v5305_v15 }
 0x136   :  { %4280 = vmatprep.subr.bf16.mxu0 %v4751_v0  ;;  %4424 = vmatprep.subr.bf16.mxu1 %v4751_v0 }
 0x139   :  { %4282 = vmatpush3.bf16.msra.mxu0 %v5313_v22  ;;  %4426 = vmatpush3.bf16.msra.mxu1 %v5313_v22 }
 0x13a   :  { %4283 = vmatprep.subr.bf16.mxu0 %v4751_v0  ;;  %4427 = vmatprep.subr.bf16.mxu1 %v4751_v0 }
 0x13d   :  { %4285 = vmatpush3.bf16.msra.mxu0 %v5319_v23  ;;  %4429 = vmatpush3.bf16.msra.mxu1 %v5319_v23 }
 0x13e   :  { %4286 = vmatprep.subr.bf16.mxu0 %v4751_v0  ;;  %4430 = vmatprep.subr.bf16.mxu1 %v4751_v0 }
 0x1f3   :  { %v753_v36 = vpop.f32.mrb[0].mxu0  ;;  %v1395_v46 = vpop.f32.mrb[0].mxu1 }
 0x1f4   :  { %v5401_v47 = vand.u32 4294901760, %v753_v36  ;;  %v5403_v49 = vand.u32 4294901760, %v1395_v46  ;;  %v3343_v4 = vpop.f32.mrb[1].mxu0  ;;  %v3553_v6 = vpop.f32.mrb[1].mxu1 }
 0x1f5   :  { %v1516_v4 = vand.u32 4294901760, %v1515_v7  ;;  %v5448_v6 = vsub.f32 %v5267_v14, %v1424_v39  ;;  %v1543_v14 = vsub.f32 %v5427_v31, %v1542_v53 }
 0x1f6   :  { %v5414_v27 = vsub.f32 %v753_v36, %v5401_v47  ;;  %v5417_v59 = vsub.f32 %v1395_v46, %v5403_v49  ;;  %v1509_v36 = vand.u32 4294901760, %v1508_v5  ;;  %v1522_v46 = vsub.f32 %v5388_v13, %v1521_v50 }
 0x1f7   :  { %v5453_v5 = vsub.f32 %v5269_v33, %v1427_v40  ;;  %v1549_v33 = vand.u32 4294901760, %v5448_v6  ;;  %v5466_v40 = vsub.f32 %v5283_v42, %v1430_v45 }
 0x1f8   :  { %v1482_v37 = vand.u32 4294901760, %v5414_v27  ;;  %v2124_v38 = vand.u32 4294901760, %v5417_v59  ;;  %v4290_v20 = vpack.c.bf16 %v1516_v4, %v1509_v36  ;;  %v1523_v60 = vand.u32 4294901760, %v1522_v46 }
 0x1f9   :  { %v1556_v39 = vand.u32 4294901760, %v5453_v5  ;;  %v1537_v36 = vand.u32 4294901760, %v1536_v32  ;;  %v1544_v4 = vand.u32 4294901760, %v1543_v14  ;;  %v1550_v42 = vsub.f32 %v5448_v6, %v1549_v33 }
 0x1fa   :  { %v1483_v41 = vsub.f32 %v5414_v27, %v1482_v37  ;;  %v2125_v10 = vsub.f32 %v5417_v59, %v2124_v38  ;;  %v4293_v18 = vpack.c.bf16 %v1530_v26, %v1523_v60  ;;  %v1563_v45 = vand.u32 4294901760, %v5466_v40 }
 0x1fb   :  { %v4296_v26 = vpack.c.bf16 %v1544_v4, %v1537_v36  ;;  %v1551_v60 = vand.u32 4294901760, %v1550_v42  ;;  %v4311_v32 = vpack.c.bf16 %v5369_v3, %v5364_v2  ;;  %v4320_v14 = vpack.c.bf16 %v5427_v31, %v5422_v30 }
 0x1fc   :  { %v1484_v7 = vand.u32 4294901760, %v1483_v41  ;;  %v2126_v9 = vand.u32 4294901760, %v2125_v10  ;;  %v1564_v46 = vsub.f32 %v5466_v40, %v1563_v45  ;;  %v4365_v2 = vpack.c.bf16 %v1528_v48, %v1521_v50  ;;  %v2724_v50 = vld [vmem:[#allocation5] ss:$0 sm:$0xff]  ;;  %v2725_v48 = vld [vmem:[#allocation7] ss:$0 sm:$0xff] }
 0x1fd   :  { %v4368_v3 = vpack.c.bf16 %v1542_v53, %v1535_v11 }
 0x1fe   :  { %3587 = vmatmul.mubr.f32.vlgmr.msra.gmra.mrb[2].mxu0 %v1484_v7  ;;  %3797 = vmatmul.mubr.f32.vlgmr.msra.gmra.mrb[2].mxu1 %v2126_v9  ;;  %v5471_v9 = vsub.f32 %v5285_v43, %v1433_v61  ;;  %v1557_v43 = vsub.f32 %v5453_v5, %v1556_v39  ;;  %v1565_v10 = vand.u32 4294901760, %v1564_v46 }
 0x1ff   :  { %4288 = vmatpush3.bf16.msra.mxu0 %v4287_v54  ;;  %4432 = vmatpush3.bf16.msra.mxu1 %v4287_v54 }
 0x200   :  { %4289 = vmatprep.subr.bf16.mxu0 %v4751_v0  ;;  %4433 = vmatprep.subr.bf16.mxu1 %v4751_v0  ;;  %v1570_v61 = vand.u32 4294901760, %v5471_v9  ;;  %v4326_v36 = vpack.c.bf16 %v5471_v9, %v5466_v40 }
 0x201   :  { %3621 = vmatprep.mubr.msk.f32.mxu0 %vm4752_vm0, %v4753_v1  ;;  %3831 = vmatprep.mubr.msk.f32.mxu1 %vm4752_vm0, %v4753_v1 }
 0x202   :  { %v1571_v24 = vsub.f32 %v5471_v9, %v1570_v61 }
 0x203   :  { %4291 = vmatpush3.bf16.msra.mxu0 %v4290_v20  ;;  %4435 = vmatpush3.bf16.msra.mxu1 %v4290_v20  ;;  %v1558_v20 = vand.u32 4294901760, %v1557_v43 }
 0x204   :  { %4292 = vmatprep.subr.bf16.mxu0 %v4751_v0  ;;  %4436 = vmatprep.subr.bf16.mxu1 %v4751_v0  ;;  %v1572_v54 = vand.u32 4294901760, %v1571_v24 }
 0x205   :  { %v4299_v41 = vpack.c.bf16 %v1558_v20, %v1551_v60 }
 0x206   :  { %v4302_v7 = vpack.c.bf16 %v1572_v54, %v1565_v10 }
 0x207   :  { %4294 = vmatpush3.bf16.msra.mxu0 %v4293_v18  ;;  %4438 = vmatpush3.bf16.msra.mxu1 %v4293_v18  ;;  %v4323_v18 = vpack.c.bf16 %v5453_v5, %v5448_v6 }
 0x208   :  { %4295 = vmatprep.subr.bf16.mxu0 %v4751_v0  ;;  %4439 = vmatprep.subr.bf16.mxu1 %v4751_v0 }
 0x20b   :  { %4297 = vmatpush3.bf16.msra.mxu0 %v4296_v26  ;;  %4441 = vmatpush3.bf16.msra.mxu1 %v4296_v26 }
 0x20c   :  { %4298 = vmatprep.subr.bf16.mxu0 %v4751_v0  ;;  %4442 = vmatprep.subr.bf16.mxu1 %v4751_v0 }
 0x20f   :  { %4300 = vmatpush3.bf16.msra.mxu0 %v4299_v41  ;;  %4444 = vmatpush3.bf16.msra.mxu1 %v4299_v41 }
 0x210   :  { %4301 = vmatprep.subr.bf16.mxu0 %v4751_v0  ;;  %4445 = vmatprep.subr.bf16.mxu1 %v4751_v0 }
 0x213   :  { %4303 = vmatpush3.bf16.msra.mxu0 %v4302_v7  ;;  %4447 = vmatpush3.bf16.msra.mxu1 %v4302_v7 }
 0x214   :  { %4304 = vmatprep.subr.bf16.mxu0 %v4751_v0  ;;  %4448 = vmatprep.subr.bf16.mxu1 %v4751_v0 }
 0x217   :  { %4306 = vmatpush3.bf16.msra.mxu0 %v5349_v35  ;;  %4450 = vmatpush3.bf16.msra.mxu1 %v5349_v35  ;;  %v4314_v35 = vpack.c.bf16 %v5379_v63, %v5374_v16  ;;  %v4371_v16 = vpack.c.bf16 %v1556_v39, %v1549_v33  ;;  %v4374_v63 = vpack.c.bf16 %v1570_v61, %v1563_v45 }
 0x218   :  { %4307 = vmatprep.subr.bf16.mxu0 %v4751_v0  ;;  %4451 = vmatprep.subr.bf16.mxu1 %v4751_v0 }
 0x21b   :  { %4309 = vmatpush3.bf16.msra.mxu0 %v5351_v51  ;;  %4453 = vmatpush3.bf16.msra.mxu1 %v5351_v51  ;;  %v4317_v51 = vpack.c.bf16 %v5393_v29, %v5388_v13  ;;  %v5710_v13 = vand.u32 4294901760, %v5336_v28 }
 0x21c   :  { %4310 = vmatprep.subr.bf16.mxu0 %v4751_v0  ;;  %4454 = vmatprep.subr.bf16.mxu1 %v4751_v0 }
 0x21e   :  { %3622 = vmatmul.mubr.f32.vlgmr.msra.gmra.mrb[2].mxu0 %v5401_v47  ;;  %3832 = vmatmul.mubr.f32.vlgmr.msra.gmra.mrb[2].mxu1 %v5403_v49 }
 0x21f   :  { %4312 = vmatpush3.bf16.msra.mxu0 %v4311_v32  ;;  %4456 = vmatpush3.bf16.msra.mxu1 %v4311_v32 }
 0x220   :  { %4313 = vmatprep.subr.bf16.mxu0 %v4751_v0  ;;  %4457 = vmatprep.subr.bf16.mxu1 %v4751_v0 }
 0x221   :  { %3656 = vmatprep.mubr.msk.f32.mxu0 %vm4752_vm0, %v4753_v1  ;;  %3866 = vmatprep.mubr.msk.f32.mxu1 %vm4752_vm0, %v4753_v1 }
 0x223   :  { %4315 = vmatpush3.bf16.msra.mxu0 %v4314_v35  ;;  %4459 = vmatpush3.bf16.msra.mxu1 %v4314_v35 }
 0x224   :  { %4316 = vmatprep.subr.bf16.mxu0 %v4751_v0  ;;  %4460 = vmatprep.subr.bf16.mxu1 %v4751_v0 }
 0x227   :  { %4318 = vmatpush3.bf16.msra.mxu0 %v4317_v51  ;;  %4462 = vmatpush3.bf16.msra.mxu1 %v4317_v51 }
 0x228   :  { %4319 = vmatprep.subr.bf16.mxu0 %v4751_v0  ;;  %4463 = vmatprep.subr.bf16.mxu1 %v4751_v0 }
 0x22b   :  { %4321 = vmatpush3.bf16.msra.mxu0 %v4320_v14  ;;  %4465 = vmatpush3.bf16.msra.mxu1 %v4320_v14 }
 0x22c   :  { %4322 = vmatprep.subr.bf16.mxu0 %v4751_v0  ;;  %4466 = vmatprep.subr.bf16.mxu1 %v4751_v0 }
 0x22f   :  { %4324 = vmatpush3.bf16.msra.mxu0 %v4323_v18  ;;  %4468 = vmatpush3.bf16.msra.mxu1 %v4323_v18 }
 0x230   :  { %4325 = vmatprep.subr.bf16.mxu0 %v4751_v0  ;;  %4469 = vmatprep.subr.bf16.mxu1 %v4751_v0 }
 0x233   :  { %4327 = vmatpush3.bf16.msra.mxu0 %v4326_v36  ;;  %4471 = vmatpush3.bf16.msra.mxu1 %v4326_v36 }
 0x234   :  { %4328 = vmatprep.subr.bf16.mxu0 %v4751_v0  ;;  %4472 = vmatprep.subr.bf16.mxu1 %v4751_v0 }
 0x237   :  { %4330 = vmatpush3.bf16.msra.mxu0 %v5355_v57  ;;  %4474 = vmatpush3.bf16.msra.mxu1 %v5355_v57  ;;  %v4359_v57 = vpack.c.bf16 %v1500_v12, %v1493_v17  ;;  %v5707_v17 = vand.u32 4294901760, %v5325_v25  ;;  %v5708_v12 = vand.u32 4294901760, %v5327_v56 }
 0x238   :  { %4331 = vmatprep.subr.bf16.mxu0 %v4751_v0  ;;  %4475 = vmatprep.subr.bf16.mxu1 %v4751_v0 }
 0x23b   :  { %4333 = vmatpush3.bf16.msra.mxu0 %v5359_v58  ;;  %4477 = vmatpush3.bf16.msra.mxu1 %v5359_v58  ;;  %v4362_v58 = vpack.c.bf16 %v1514_v21, %v1507_v19  ;;  %v4377_v19 = vpack.c.bf16 %v5708_v12, %v5707_v17  ;;  %v5709_v21 = vand.u32 4294901760, %v5334_v62 }
 0x23c   :  { %4334 = vmatprep.subr.bf16.mxu0 %v4751_v0  ;;  %4478 = vmatprep.subr.bf16.mxu1 %v4751_v0 }
 0x23d   :  { %v4380_v29 = vpack.c.bf16 %v5710_v13, %v5709_v21 }
 0x23e   :  { %3657 = vmatmul.mubr.f32.vlgmr.msra.gmra.mrb[2].mxu0 %v5414_v27  ;;  %3867 = vmatmul.mubr.f32.vlgmr.msra.gmra.mrb[2].mxu1 %v5417_v59 }
 0x23f   :  { %4336 = vmatpush3.bf16.msra.mxu0 %v5223_v52  ;;  %4480 = vmatpush3.bf16.msra.mxu1 %v5223_v52 }
 0x240   :  { %4337 = vmatprep.subr.bf16.mxu0 %v4751_v0  ;;  %4481 = vmatprep.subr.bf16.mxu1 %v4751_v0 }
 0x241   :  { %3691 = vmatprep.mubr.msk.f32.mxu0 %vm4752_vm0, %v4753_v1  ;;  %3901 = vmatprep.mubr.msk.f32.mxu1 %vm4752_vm0, %v4753_v1 }
 0x243   :  { %4339 = vmatpush3.bf16.msra.mxu0 %v5241_v55  ;;  %4483 = vmatpush3.bf16.msra.mxu1 %v5241_v55 }
 0x244   :  { %4340 = vmatprep.subr.bf16.mxu0 %v4751_v0  ;;  %4484 = vmatprep.subr.bf16.mxu1 %v4751_v0 }
 0x247   :  { %4342 = vmatpush3.bf16.msra.mxu0 %v5261_v8  ;;  %4486 = vmatpush3.bf16.msra.mxu1 %v5261_v8 }
 0x248   :  { %4343 = vmatprep.subr.bf16.mxu0 %v4751_v0  ;;  %4487 = vmatprep.subr.bf16.mxu1 %v4751_v0 }
 0x24b   :  { %4345 = vmatpush3.bf16.msra.mxu0 %v5277_v34  ;;  %4489 = vmatpush3.bf16.msra.mxu1 %v5277_v34 }
 0x24c   :  { %4346 = vmatprep.subr.bf16.mxu0 %v4751_v0  ;;  %4490 = vmatprep.subr.bf16.mxu1 %v4751_v0 }
 0x24f   :  { %4348 = vmatpush3.bf16.msra.mxu0 %v5293_v44  ;;  %4492 = vmatpush3.bf16.msra.mxu1 %v5293_v44 }
 0x250   :  { %4349 = vmatprep.subr.bf16.mxu0 %v4751_v0  ;;  %4493 = vmatprep.subr.bf16.mxu1 %v4751_v0 }
 0x253   :  { %4351 = vmatpush3.bf16.msra.mxu0 %v5305_v15  ;;  %4495 = vmatpush3.bf16.msra.mxu1 %v5305_v15 }
 0x254   :  { %4352 = vmatprep.subr.bf16.mxu0 %v4751_v0  ;;  %4496 = vmatprep.subr.bf16.mxu1 %v4751_v0 }
 0x257   :  { %4354 = vmatpush3.bf16.msra.mxu0 %v5313_v22  ;;  %4498 = vmatpush3.bf16.msra.mxu1 %v5313_v22 }
 0x258   :  { %4355 = vmatprep.subr.bf16.mxu0 %v4751_v0  ;;  %4499 = vmatprep.subr.bf16.mxu1 %v4751_v0 }
 0x25b   :  { %4357 = vmatpush3.bf16.msra.mxu0 %v5319_v23  ;;  %4501 = vmatpush3.bf16.msra.mxu1 %v5319_v23 }
 0x25c   :  { %4358 = vmatprep.subr.bf16.mxu0 %v4751_v0  ;;  %4502 = vmatprep.subr.bf16.mxu1 %v4751_v0 }
 0x25e   :  { %3692 = vmatmul.mubr.f32.vlgmr.msra.gmra.mrb[2].mxu0 %v1482_v37  ;;  %3902 = vmatmul.mubr.f32.vlgmr.msra.gmra.mrb[2].mxu1 %v2124_v38 }
 0x25f   :  { %4360 = vmatpush3.bf16.msra.mxu0 %v4359_v57  ;;  %4504 = vmatpush3.bf16.msra.mxu1 %v4359_v57 }
 0x260   :  { %4361 = vmatprep.subr.bf16.mxu0 %v4751_v0  ;;  %4505 = vmatprep.subr.bf16.mxu1 %v4751_v0 }
 0x261   :  { %3726 = vmatprep.mubr.msk.f32.mxu0 %vm4752_vm0, %v4753_v1  ;;  %3936 = vmatprep.mubr.msk.f32.mxu1 %vm4752_vm0, %v4753_v1 }
 0x263   :  { %4363 = vmatpush3.bf16.msra.mxu0 %v4362_v58  ;;  %4507 = vmatpush3.bf16.msra.mxu1 %v4362_v58 }
 0x264   :  { %4364 = vmatprep.subr.bf16.mxu0 %v4751_v0  ;;  %4508 = vmatprep.subr.bf16.mxu1 %v4751_v0 }
 0x267   :  { %4366 = vmatpush3.bf16.msra.mxu0 %v4365_v2  ;;  %4510 = vmatpush3.bf16.msra.mxu1 %v4365_v2 }
 0x268   :  { %4367 = vmatprep.subr.bf16.mxu0 %v4751_v0  ;;  %4511 = vmatprep.subr.bf16.mxu1 %v4751_v0 }
 0x26b   :  { %4369 = vmatpush3.bf16.msra.mxu0 %v4368_v3  ;;  %4513 = vmatpush3.bf16.msra.mxu1 %v4368_v3 }
 0x26c   :  { %4370 = vmatprep.subr.bf16.mxu0 %v4751_v0  ;;  %4514 = vmatprep.subr.bf16.mxu1 %v4751_v0 }
 0x26f   :  { %4372 = vmatpush3.bf16.msra.mxu0 %v4371_v16  ;;  %4516 = vmatpush3.bf16.msra.mxu1 %v4371_v16 }
 0x270   :  { %4373 = vmatprep.subr.bf16.mxu0 %v4751_v0  ;;  %4517 = vmatprep.subr.bf16.mxu1 %v4751_v0 }
 0x273   :  { %4375 = vmatpush3.bf16.msra.mxu0 %v4374_v63  ;;  %4519 = vmatpush3.bf16.msra.mxu1 %v4374_v63 }
 0x274   :  { %4376 = vmatprep.subr.bf16.mxu0 %v4751_v0  ;;  %4520 = vmatprep.subr.bf16.mxu1 %v4751_v0 }
 0x277   :  { %4378 = vmatpush3.bf16.msra.mxu0 %v4377_v19  ;;  %4522 = vmatpush3.bf16.msra.mxu1 %v4377_v19 }
 0x278   :  { %4379 = vmatprep.subr.bf16.mxu0 %v4751_v0  ;;  %4523 = vmatprep.subr.bf16.mxu1 %v4751_v0 }
 0x27b   :  { %4381 = vmatpush3.bf16.msra.mxu0 %v4380_v29  ;;  %4525 = vmatpush3.bf16.msra.mxu1 %v4380_v29 }
 0x27c   :  { %4382 = vmatprep.subr.bf16.mxu0 %v4751_v0  ;;  %4526 = vmatprep.subr.bf16.mxu1 %v4751_v0 }
 0x27e   :  { %3727 = vmatmul.mubr.f32.vlgmr.msra.gmra.mrb[2].mxu0 %v5401_v47  ;;  %3937 = vmatmul.mubr.f32.vlgmr.msra.gmra.mrb[2].mxu1 %v5403_v49 }
 0x27f   :  { %4384 = vmatpush3.bf16.msra.mxu0 %v5223_v52  ;;  %4528 = vmatpush3.bf16.msra.mxu1 %v5223_v52 }
 0x280   :  { %4385 = vmatprep.subr.bf16.mxu0 %v4751_v0  ;;  %4529 = vmatprep.subr.bf16.mxu1 %v4751_v0 }
 0x281   :  { %3761 = vmatprep.mubr.msk.f32.mxu0 %vm4752_vm0, %v4753_v1  ;;  %3971 = vmatprep.mubr.msk.f32.mxu1 %vm4752_vm0, %v4753_v1 }
 0x283   :  { %4387 = vmatpush3.bf16.msra.mxu0 %v5241_v55  ;;  %4531 = vmatpush3.bf16.msra.mxu1 %v5241_v55 }
 0x284   :  { %4388 = vmatprep.subr.bf16.mxu0 %v4751_v0  ;;  %4532 = vmatprep.subr.bf16.mxu1 %v4751_v0 }
 0x287   :  { %4390 = vmatpush3.bf16.msra.mxu0 %v5261_v8  ;;  %4534 = vmatpush3.bf16.msra.mxu1 %v5261_v8 }
 0x288   :  { %4391 = vmatprep.subr.bf16.mxu0 %v4751_v0  ;;  %4535 = vmatprep.subr.bf16.mxu1 %v4751_v0 }
 0x28b   :  { %4393 = vmatpush3.bf16.msra.mxu0 %v5277_v34  ;;  %4537 = vmatpush3.bf16.msra.mxu1 %v5277_v34 }
 0x28c   :  { %4394 = vmatprep.subr.bf16.mxu0 %v4751_v0  ;;  %4538 = vmatprep.subr.bf16.mxu1 %v4751_v0 }
 0x28f   :  { %4396 = vmatpush3.bf16.msra.mxu0 %v5293_v44  ;;  %4540 = vmatpush3.bf16.msra.mxu1 %v5293_v44 }
 0x290   :  { %4397 = vmatprep.subr.bf16.mxu0 %v4751_v0  ;;  %4541 = vmatprep.subr.bf16.mxu1 %v4751_v0 }
 0x293   :  { %4399 = vmatpush3.bf16.msra.mxu0 %v5305_v15  ;;  %4543 = vmatpush3.bf16.msra.mxu1 %v5305_v15 }
 0x294   :  { %4400 = vmatprep.subr.bf16.mxu0 %v4751_v0  ;;  %4544 = vmatprep.subr.bf16.mxu1 %v4751_v0 }
 0x297   :  { %4402 = vmatpush3.bf16.msra.mxu0 %v5313_v22  ;;  %4546 = vmatpush3.bf16.msra.mxu1 %v5313_v22 }
 0x298   :  { %4403 = vmatprep.subr.bf16.mxu0 %v4751_v0  ;;  %4547 = vmatprep.subr.bf16.mxu1 %v4751_v0  ;;  %v4603_v0 = vld [vmem:[#allocation2] sm:$0xf] }
 0x29b   :  { %4405 = vmatpush3.bf16.msra.mxu0 %v5319_v23  ;;  %4549 = vmatpush3.bf16.msra.mxu1 %v5319_v23 }
 0x29e   :  { %3762 = vmatmul.mubr.f32.vlgmr.msra.gmra.mrb[2].mxu0 %v5401_v47  ;;  %3972 = vmatmul.mubr.f32.vlgmr.msra.gmra.mrb[2].mxu1 %v5403_v49 }
 0x371   :  { %v2036_v1 = vpop.f32.mrb[2].mxu0  ;;  %v2678_v52 = vpop.f32.mrb[2].mxu1 }
 0x372   :  { %v2040_v55 = vmul.f32 0.03125, %v2036_v1  ;;  %v3763_v8 = vpop.f32.mrb[3].mxu0  ;;  %v3973_v34 = vpop.f32.mrb[3].mxu1  ;;  %v2682_v15 = vmul.f32 0.03125, %v2678_v52 }
 0x374   :  { %v2683_v44 = vmul.f32 %v2040_v55, %v2040_v55  ;;  %v2688_v62 = vsub.f32 %v4603_v0, %v2040_v55 }
 0x376   :  { %v2684_v22 = vsub.f32 %v2682_v15, %v2683_v44 }
 0x378   :  { %v2685_v25 = vmax.f32 %v2684_v22, 0.0 }
 0x37a   :  { %v2686_v56 = vadd.f32 1e-05, %v2685_v25 }
 0x37c   :  { %4601 = vrsqrt.f32 %v2686_v56 }
 0x386   :  { %v4602_v28 = vpop.eup %4601 }
 0x387   :  { %v2689_v23 = vmul.f32 %v4602_v28, %v2688_v62 }
 0x389   :  { %v2697_v47 = vmul.f32 %v2724_v50, %v2689_v23 }
 0x38b   :  { %v2705_v49 = vadd.f32 %v2725_v48, %v2697_v47 }
 0x38d   :  { %2706 = vst [vmem:[#allocation11] sm:$0xf] %v2705_v49 }
 0x38e   :  { %4725 = shalt.err (!%p4722_p2)
}
 0x38f   :  { %s4726_s21 = scalar_lea.hbm %s5698_s5, 64 }
 0x390   :  { %p4727_p3 = scmp.ne.s32.totalorder %s5698_s5, %s4726_s21  ;;  %p4730_p4 = scmp.lt.u32.totalorder %s4726_s21, %s5698_s5 }
 0x392   :  { %p4732_p5 = pnand %p4730_p4, %p4727_p3 }
 0x394   :  { %4735 = shalt.err (!%p4732_p5)
}
 0x395   :  { %2716 = dma.vmem_to_hbm [thread:$0]  %s2714_s1, 64, %s5698_s5, [#allocation4]  }
 0x396   :  { %4742 = dma.done.wait [#allocation4], 64  }
 0x397   :  { %4743 = vsyncadd [#allocation4], 4294967232 }
 0x398   :  { %2720 = vsyncpa [#allocation3], 1 }
 0x399   :  { %2721 = vsyncpa [#allocation6], 1 }
 0x39a   :  { %2722 = vsyncpa [#allocation9], 1 }
 0x39b   :  { %2723 = vsyncpa [#allocation4], 1 }

</bundles_post_ra>
